<compile_context>
chip_gen: v5e
topology: v5e:2x2
jax: 0.10.0
libtpu: 0.0.40
codegen_flags: <defaults>
</compile_context>

<pallas_src>
import jax
import jax.numpy as jnp
from jax.experimental import pallas as pl
from jax.experimental.pallas import tpu as pltpu


def _nconv_kernel(a_ref, x_ref, o_ref):
  # a_ref: [tile_n, W, V]   x_ref: [tile_n, V, tile_m]   o_ref: [tile_n, W, tile_m]
  a = a_ref[...]
  x = x_ref[...]
  if a.dtype != x.dtype:
    ct = jnp.promote_types(a.dtype, x.dtype)
    a = a.astype(ct)
    x = x.astype(ct)
  o_ref[...] = jax.lax.dot_general(
      a, x,
      dimension_numbers=(((2,), (1,)), ((0,), (0,))),
      preferred_element_type=jnp.float32,
  ).astype(o_ref.dtype)


def _round_up(x, m):
  return ((x + m - 1) // m) * m


def _device_vmem_bytes():
  """Physical VMEM per TensorCore; conservative 64 MiB fallback (v7x)."""
  try:
    info = pltpu.get_tpu_info()
    cap = getattr(info, "vmem_capacity_bytes", None)
    if cap:
      return int(cap)
  except Exception:
    pass
  return 64 * 1024 * 1024


def _num_tensorcores():
  """TensorCores per chip; defaults to 1 (v5e/v6e) if not discoverable."""
  try:
    info = pltpu.get_tpu_info()
    for attr in ("num_cores", "tensorcore_count", "num_tensorcores",
                 "cores_per_chip"):
      v = getattr(info, attr, None)
      if v:
        return max(1, int(v))
  except Exception:
    pass
  try:
    return max(1, int(getattr(jax.devices()[0], "num_cores", 1)))
  except Exception:
    return 1


def _pick_tiles(n, w, v, m, itemsize, vmem_budget_bytes, num_cores):
  """Choose (tile_n, tile_m) so the double-buffered, (8,128)-padded working
  set fits the VMEM budget; keep >= 2 grid steps along N only on multi-TC
  chips."""
  max_tile_m = 2048
  tile_m = m if m <= max_tile_m else max_tile_m

  def per_n_bytes(tm_):
    rw = _round_up(w, 8)
    rv_lane = _round_up(v, 128)
    rv_sub = _round_up(v, 8)
    rm = _round_up(tm_, 128)
    # double-buffered A, x and out blocks, per unit of tile_n
    return 2 * itemsize * (rw * rv_lane + rv_sub * rm + rw * rm)

  # Shrink the M tile (multiples of 128) until even tile_n == 1 fits.
  while per_n_bytes(tile_m) > vmem_budget_bytes and tile_m > 128:
    tile_m = max(128, _round_up(tile_m // 2, 128))

  tile_n = max(1, vmem_budget_bytes // per_n_bytes(tile_m))
  tile_n = min(tile_n, n)
  if num_cores > 1 and n >= 2:
    # keep >= 2 grid steps over N so both TensorCores get work (v7x)
    tile_n = min(tile_n, max(1, (n + 1) // 2))
  return int(tile_n), int(tile_m)


def nconv(x, A):
  """x: [N, C, V, L], A: [N, W, V]  ->  [N, C, W, L]
  (== jnp.einsum('ncvl,nwv->ncwl', x, A))."""
  N, C, V, L = x.shape
  W = A.shape[1]
  M = C * L
  out_dtype = jnp.result_type(x.dtype, A.dtype)
  itemsize = jnp.dtype(out_dtype).itemsize

  # Lane-dense layout for the batched matmul: [N, V, C*L]. With
  # allow_input_fusion below XLA may fuse this transpose into the operand
  # instead of materialising it in HBM.
  x2 = jnp.transpose(x, (0, 2, 1, 3)).reshape(N, V, M)

  vmem_cap = _device_vmem_bytes()
  vmem_limit = int(min(vmem_cap * 3 // 4, 112 * 1024 * 1024))
  tile_budget = vmem_limit * 2 // 3
  tile_n, tile_m = _pick_tiles(N, W, V, M, itemsize, tile_budget,
                               _num_tensorcores())

  grid = (pl.cdiv(N, tile_n), pl.cdiv(M, tile_m))

  cost = pl.CostEstimate(
      flops=2 * N * W * V * M,
      transcendentals=0,
      bytes_accessed=(N * W * V + N * V * M + N * W * M) * itemsize)

  out2 = pl.pallas_call(
      _nconv_kernel,
      out_shape=jax.ShapeDtypeStruct((N, W, M), out_dtype),
      grid=grid,
      in_specs=[
          # A block index is constant along j -> Pallas skips re-fetching it.
          pl.BlockSpec((tile_n, W, V), lambda i, j: (i, 0, 0)),
          pl.BlockSpec((tile_n, V, tile_m), lambda i, j: (i, 0, j)),
      ],
      out_specs=pl.BlockSpec((tile_n, W, tile_m), lambda i, j: (i, 0, j)),
      compiler_params=pltpu.CompilerParams(
          dimension_semantics=("parallel", "parallel"),
          vmem_limit_bytes=vmem_limit,
          allow_input_fusion=[False, True]),
      cost_estimate=cost,
  )(A, x2)

  # [N, W, C*L] -> [N, W, C, L] -> [N, C, W, L]
  # TODO(synk): in the full model the downstream 1x1 conv over C can consume
  # the [N, W, C, L] slab directly, removing this extra HBM round-trip.
  return jnp.transpose(out2.reshape(N, W, C, L), (0, 2, 1, 3))


if __name__ == "__main__":
  key = jax.random.PRNGKey(0)
  N, C, V, L = 2, 4, 16, 8   # batch, channels, nodes, seq
  W = 16                     # output node dim of A ('nwv')

  kx, ka = jax.random.split(key)
  x = jax.random.normal(kx, (N, C, V, L), jnp.float32)
  A = jax.random.normal(ka, (N, W, V), jnp.float32)

  out = jax.jit(nconv)(x, A)
  jax.block_until_ready(out)

  ref = jnp.einsum("ncvl,nwv->ncwl", x, A)
  assert out.shape == (N, C, W, L), out.shape
  assert jnp.allclose(out, ref, atol=1e-4, rtol=1e-4), float(
      jnp.max(jnp.abs(out - ref)))
  print("KERNEL_OK")
</pallas_src>

<mosaic_0001>
module attributes {stable_mosaic.version = 11 : i64} {
  func.func @_nconv_kernel(%arg0: i32, %arg1: i32, %arg2: memref<2x16x16xf32, #tpu.memory_space<vmem>>, %arg3: memref<2x16x32xf32, #tpu.memory_space<vmem>>, %arg4: memref<2x16x32xf32, #tpu.memory_space<vmem>>) attributes {dimension_semantics = [#tpu.dimension_semantics<parallel>, #tpu.dimension_semantics<parallel>], iteration_bounds = array<i64: 1, 1>, scalar_prefetch = 0 : i64, scratch_operands = 0 : i64, tpu.core_type = #tpu.core_type<tc>, window_params = [{transform_indices = @transform_0, window_bounds = array<i64: 2, 16, 16>}, {transform_indices = @transform_1, window_bounds = array<i64: 2, 16, 32>}, {transform_indices = @transform_2, window_bounds = array<i64: 2, 16, 32>}]} {
    %c0 = arith.constant 0 : index
    %c0_0 = arith.constant 0 : index
    %c0_1 = arith.constant 0 : index
    %0 = vector.load %arg2[%c0, %c0_0, %c0_1] : memref<2x16x16xf32, #tpu.memory_space<vmem>>, vector<2x16x16xf32>
    %c0_2 = arith.constant 0 : index
    %c0_3 = arith.constant 0 : index
    %c0_4 = arith.constant 0 : index
    %1 = vector.load %arg3[%c0_2, %c0_3, %c0_4] : memref<2x16x32xf32, #tpu.memory_space<vmem>>, vector<2x16x32xf32>
    %cst = arith.constant dense<0.000000e+00> : vector<2x16x32xf32>
    %2 = tpu.matmul %0, %1, %cst {dimension_numbers = #tpu.dot_dimension_numbers<[2], [1], [1], [2], [0, 0, 0, 1, 1, 2], [0], [0]>} : vector<2x16x16xf32>, vector<2x16x32xf32>, vector<2x16x32xf32> -> vector<2x16x32xf32>
    %c0_5 = arith.constant 0 : index
    %c0_6 = arith.constant 0 : index
    %c0_7 = arith.constant 0 : index
    %3 = vector.load %arg4[%c0_5, %c0_6, %c0_7] : memref<2x16x32xf32, #tpu.memory_space<vmem>>, vector<2x16x32xf32>
    tpu.vector_store %arg4[%c0_5, %c0_6, %c0_7], %2 {strides = array<i32>} : memref<2x16x32xf32, #tpu.memory_space<vmem>>, vector<2x16x32xf32>,
    return
  }
  func.func @transform_0(%arg0: i32, %arg1: i32) -> (i32, i32, i32) {
    %c0_i32 = arith.constant 0 : i32
    %c0_i32_0 = arith.constant 0 : i32
    %c0_i32_1 = arith.constant 0 : i32
    return %arg0, %c0_i32, %c0_i32_0 : i32, i32, i32
  }
  func.func @transform_1(%arg0: i32, %arg1: i32) -> (i32, i32, i32) {
    %c0_i32 = arith.constant 0 : i32
    %c0_i32_0 = arith.constant 0 : i32
    return %arg0, %c0_i32, %arg1 : i32, i32, i32
  }
  func.func @transform_2(%arg0: i32, %arg1: i32) -> (i32, i32, i32) {
    %c0_i32 = arith.constant 0 : i32
    %c0_i32_0 = arith.constant 0 : i32
    return %arg0, %c0_i32, %arg1 : i32, i32, i32
  }
}

</mosaic_0001>

<bundles_post_ra>
// kernel: nconv.1
= control target key start
LH: loop header
LB: loop body
LE: loop exit
PB: predicated region body
PF: predicated region fallthrough
CT: control target
= control target key end

     0   :  { %vm19_vm0 = vcmask 130048   ;;  %vm78_vm1 = vcmask 261120   ;;  %s146_s1 = inlined_call_operand.vmem [shape: f32[2,16,32], index: 1, kind: input, shape index: {}]   ;;  %s147_s0 = inlined_call_operand.vmem [shape: f32[2,16,16], index: 0, kind: input, shape index: {}]   ;;  %s148_s2 = inlined_call_operand.vmem [shape: f32[2,16,32], index: 2, kind: output, shape index: {}]  }
   0x1   :  { %v16_v0 = vld [vmem:[%s146_s1 + $0x8] sm:$0xff]  ;;  %v18_v1 = vld [vmem:[%s146_s1 + $0x18] sm:$0xff]  ;;  %v15_v2 = vld [vmem:[%s146_s1] sm:$0xff] }
   0x2   :  { %91 = vmatpush.msra.mxu2 %v16_v0  ;;  %93 = vmatpush.msra.mxu3 %v18_v1  ;;  %v17_v3 = vld [vmem:[%s146_s1 + $0x10] sm:$0xff]  ;;  %v12_v4 = vld [vmem:[%s147_s0 + $0x8] sm:$0xff]  ;;  %v14_v5 = vld [vmem:[%s147_s0 + $0x18] sm:$0xff] }
   0x3   :  { %40 = vmatpush.msra.mxu0 %v16_v0  ;;  %69 = vmatpush.msra.mxu1 %v18_v1  ;;  %v11_v6 = vld [vmem:[%s147_s0] sm:$0xff]  ;;  %v13_v7 = vld [vmem:[%s147_s0 + $0x10] sm:$0xff] }
   0x4   :  { %92 = vmatpush.msra.mxu2 %v15_v2  ;;  %94 = vmatpush.msra.mxu3 %v17_v3 }
   0x5   :  { %88 = vmatmul.msk.f32.vlgmr.msra.gmra.mxu2 %vm19_vm0, %v12_v4  ;;  %90 = vmatmul.msk.f32.vlgmr.msra.gmra.mxu3 %vm19_vm0, %v14_v5 }
   0x6   :  { %41 = vmatpush.msra.mxu0 %v15_v2  ;;  %70 = vmatpush.msra.mxu1 %v17_v3 }
   0x7   :  { %87 = vmatmul.msk.f32.vlgmr.msra.gmra.mxu0 %vm19_vm0, %v11_v6  ;;  %89 = vmatmul.msk.f32.vlgmr.msra.gmra.mxu1 %vm19_vm0, %v13_v7 }
  0x84   :  { %v43_v8 = vpop.f32.mrf.mxu0  ;;  %v72_v9 = vpop.f32.mrf.mxu1 }
  0x85   :  { %79 = vst.msk [vmem:[%s148_s2] sm:$0xff] %vm78_vm1, %v43_v8 }
  0x86   :  { %81 = vst.msk [vmem:[%s148_s2 + $0x10] sm:$0xff] %vm78_vm1, %v72_v9 }
  0x88   :  { %v46_v10 = vpop.f32.mrf.mxu2  ;;  %v75_v11 = vpop.f32.mrf.mxu3 }
  0x89   :  { %80 = vst.msk [vmem:[%s148_s2 + $0x8] sm:$0xff] %vm78_vm1, %v46_v10 }
  0x8a   :  { %82 = vst.msk [vmem:[%s148_s2 + $0x18] sm:$0xff] %vm78_vm1, %v75_v11 }

</bundles_post_ra>
